<compile_context>
chip_gen: v5e
topology: v5e:2x2
jax: 0.10.0
libtpu: 0.0.40
codegen_flags: <defaults>
</compile_context>

<pallas_src>
import jax
import jax.numpy as jnp
from jax import lax
from jax.experimental import pallas as pl
from jax.experimental.pallas import tpu as pltpu

# The module's fixed (non-trainable) 3x3 filters.
KERNEL_X = ((-1.0, 0.0, 1.0),
            (-2.0, 0.0, 2.0),
            (-1.0, 0.0, 1.0))
KERNEL_Y = (( 1.0,  2.0,  1.0),
            ( 0.0,  0.0,  0.0),
            (-1.0, -2.0, -1.0))


def _make_sobel_kernel(TR, HALO, H, W):
    """Kernel over a (TR, W) row block of the flattened (N*H, W) image stack.

    `above_ref` / `below_ref` are (HALO, W) blocks of the same array that
    supply the one-row halo when a tile boundary falls inside an image:
    row HALO-1 of `above_ref` is global row (tile_start - 1) and row 0 of
    `below_ref` is global row (tile_start + TR).  At image boundaries the
    halo values are irrelevant because the row-mod masks zero them.
    """

    def kernel(x_ref, above_ref, below_ref, o_ref):
        # In-kernel upcast (free VPU work; keeps HBM traffic in orig dtype).
        x = x_ref[...].astype(jnp.float32)                      # (TR, W)
        top = above_ref[HALO - 1:HALO, :].astype(jnp.float32)   # row tile_start-1
        bot = below_ref[0:1, :].astype(jnp.float32)             # row tile_start+TR

        # Row-within-image for the zero-padding masks (applied unconditionally,
        # computed from the *global* row index so tiles may start mid-image).
        row0 = pl.program_id(0) * TR
        rmod = (row0 + lax.broadcasted_iota(jnp.int32, (TR, 1), 0)) % H

        # Vertical neighbors (sublane shift); the concatenate fuses the
        # halo-row insertion with the shift.  (TR, 1) masks broadcast over lanes.
        up = jnp.concatenate([top, x[:-1, :]], axis=0)           # x[r-1, j]
        down = jnp.concatenate([x[1:, :], bot], axis=0)          # x[r+1, j]
        up = jnp.where(rmod == 0, 0.0, up)                       # image top row
        down = jnp.where(rmod == H - 1, 0.0, down)               # image bottom row

        # Separable vertical passes (shared row reads):
        #   Kx = [1,2,1]^T (x) [-1,0,1]  -> s = up + 2x + down
        #   Ky = [1,0,-1]^T (x) [1,2,1]  -> d = up - down
        s = up + 2.0 * x + down
        d = up - down

        # Horizontal (lane-axis) neighbors with zero padding at j=0 / j=W-1.
        if W % 128 == 0:
            # Lane-aligned width: XLU rotates (pltpu.roll follows the jnp.roll
            # convention: result[j] = a[(j - shift) % W]).  Boundary masks are
            # (1, W) and broadcast inside the selects.
            col = lax.broadcasted_iota(jnp.int32, (1, W), 1)
            not_first = col != 0
            not_last = col != W - 1

            def left(a):    # a[i, j-1], zero at j == 0
                return jnp.where(not_first, pltpu.roll(a, shift=1, axis=1), 0.0)

            def right(a):   # a[i, j+1], zero at j == W-1
                return jnp.where(not_last, pltpu.roll(a, shift=W - 1, axis=1), 0.0)
        else:
            # Narrow / unaligned width: slice + concat (guaranteed to lower).
            zcol = jnp.zeros((TR, 1), jnp.float32)

            def left(a):
                return jnp.concatenate([zcol, a[:, :-1]], axis=1)

            def right(a):
                return jnp.concatenate([a[:, 1:], zcol], axis=1)

        gx = right(s) - left(s)                  # horizontal [-1, 0, 1]
        gy = left(d) + 2.0 * d + right(d)        # horizontal [ 1, 2, 1]

        # In-kernel downcast back to the original dtype at the final store.
        o_ref[...] = (jnp.abs(gx) + jnp.abs(gy)).astype(o_ref.dtype)

    return kernel


def _vmem_limit_bytes():
    """Generation-aware scoped-VMEM budget (v7x: 64 MiB/TC physical vs 128 MiB
    on v5e/v6e); conservative fallback if the query is unavailable."""
    phys = None
    try:
        phys = getattr(pltpu.get_tpu_info(), "vmem_capacity_bytes", None)
    except Exception:
        phys = None
    if not phys:
        phys = 64 * 1024 * 1024            # assume smallest (v7x per-TC)
    return int(min(max(phys // 2, 16 * 1024 * 1024), 64 * 1024 * 1024))


def _pick_row_tile(R, W, align, vmem_limit, rows_per_block=None):
    """Rows per block: ~1/12 of the VMEM budget (2 in + 2 out pipeline buffers
    plus a handful of live f32 intermediates per block), aligned to the
    sublane packing, and small enough that the grid has >= 4 steps whenever
    that keeps blocks >= 64 rows (so the fixed halo read stays small)."""
    if rows_per_block is not None:
        rows = max(align, (int(rows_per_block) // align) * align)
    else:
        target = max(vmem_limit // 12, 512 * 1024)
        rows = max(align, (target // (W * 4)) // align * align)
        for parts in (4, 2):
            split = (R // parts) // align * align
            if split >= max(64, 2 * align):
                rows = min(rows, split)
                break
    if rows >= R:
        rows = R            # single full-extent block (always a legal shape)
    return int(rows)


def sobelxy(x, *, rows_per_block=None):
    """x: (N, 1, H, W) -> (N, 1, H, W), matching Sobelxy.forward."""
    N, C, H, W = x.shape
    assert C == 1, "Sobelxy weights have in_channels = 1"
    dtype = x.dtype
    esize = jnp.dtype(dtype).itemsize
    align = 8 * max(1, 4 // max(1, esize))   # sublane packing: 8 f32, 16 bf16

    R = N * H
    x2 = x.reshape(R, W)                     # free reshape, no dtype copy

    vmem_limit = _vmem_limit_bytes()
    TR = _pick_row_tile(R, W, align, vmem_limit, rows_per_block)
    grid_len = int(pl.cdiv(R, TR))
    HALO = min(align, R)                     # halo block rows (full extent if tiny)
    GH = int(pl.cdiv(R, HALO))               # number of halo blocks along rows
    q = max(TR // HALO, 1)                   # halo blocks per main block

    if grid_len == 1:
        above_map = lambda g: (0, 0)
        below_map = lambda g: (0, 0)
    else:
        above_map = lambda g: (jnp.maximum(g * q - 1, 0), 0)
        below_map = lambda g: (jnp.minimum((g + 1) * q, GH - 1), 0)

    kernel = _make_sobel_kernel(TR, HALO, H, W)

    out = pl.pallas_call(
        kernel,
        out_shape=jax.ShapeDtypeStruct((R, W), dtype),
        grid_spec=pltpu.PrefetchScalarGridSpec(
            num_scalar_prefetch=0,
            grid=(grid_len,),
            in_specs=[
                pl.BlockSpec((TR, W), lambda g: (g, 0)),     # main row block
                pl.BlockSpec((HALO, W), above_map),          # rows just above
                pl.BlockSpec((HALO, W), below_map),          # rows just below
            ],
            out_specs=pl.BlockSpec((TR, W), lambda g: (g, 0)),
        ),
        compiler_params=pltpu.CompilerParams(
            dimension_semantics=("parallel",),
            vmem_limit_bytes=vmem_limit,
        ),
        cost_estimate=pl.CostEstimate(
            flops=14 * R * W,
            transcendentals=0,
            bytes_accessed=2 * R * W * esize + 2 * grid_len * HALO * W * esize,
        ),
    )(x2, x2, x2)

    return out.reshape(N, 1, H, W)


def _reference(x):
    """Pure-JAX reference: explicit zero-padded 3x3 cross-correlation in f32."""
    N, C, H, W = x.shape
    xp = jnp.pad(x.astype(jnp.float32), ((0, 0), (0, 0), (1, 1), (1, 1)))

    def corr(k):
        acc = jnp.zeros((N, C, H, W), jnp.float32)
        for i in range(3):
            for j in range(3):
                if k[i][j] != 0.0:
                    acc = acc + k[i][j] * xp[:, :, i:i + H, j:j + W]
        return acc

    return jnp.abs(corr(KERNEL_X)) + jnp.abs(corr(KERNEL_Y))


if __name__ == "__main__":
    # C must be 1 for this module (weight shape (1, 1, 3, 3)).
    x = jax.random.normal(jax.random.PRNGKey(0), (2, 1, 16, 16), dtype=jnp.float32)
    y = sobelxy(x)
    jax.block_until_ready(y)
    assert y.shape == (2, 1, 16, 16) and y.dtype == x.dtype
    assert jnp.allclose(y, _reference(x), atol=1e-4, rtol=1e-5), "mismatch (base)"

    # Exercise the intra-image row-tiling path: mid-image tile boundaries,
    # real halo rows, an image boundary at a tile edge, and a ragged tail.
    x2 = jax.random.normal(jax.random.PRNGKey(0), (3, 1, 24, 16), dtype=jnp.float32)
    y2 = sobelxy(x2, rows_per_block=16)
    jax.block_until_ready(y2)
    assert jnp.allclose(y2, _reference(x2), atol=1e-4, rtol=1e-5), "mismatch (tiled)"

    # Exercise the lane-aligned (pltpu.roll) horizontal path and the in-kernel
    # bf16 -> f32 -> bf16 dtype handling.
    x3 = jax.random.normal(jax.random.PRNGKey(0), (2, 1, 16, 128), dtype=jnp.bfloat16)
    y3 = sobelxy(x3)
    jax.block_until_ready(y3)
    assert y3.dtype == jnp.bfloat16
    assert jnp.allclose(y3.astype(jnp.float32),
                        _reference(x3.astype(jnp.float32)),
                        atol=0.5, rtol=0.05), "mismatch (bf16 / W=128)"

    print("KERNEL_OK")
</pallas_src>

<mosaic_0001>
module attributes {stable_mosaic.version = 11 : i64} {
  func.func @kernel(%arg0: i32, %arg1: memref<32x16xf32, #tpu.memory_space<vmem>>, %arg2: memref<8x16xf32, #tpu.memory_space<vmem>>, %arg3: memref<8x16xf32, #tpu.memory_space<vmem>>, %arg4: memref<32x16xf32, #tpu.memory_space<vmem>>) attributes {dimension_semantics = [#tpu.dimension_semantics<parallel>], iteration_bounds = array<i64: 1>, scalar_prefetch = 0 : i64, scratch_operands = 0 : i64, tpu.core_type = #tpu.core_type<tc>, window_params = [{transform_indices = @transform_0, window_bounds = array<i64: 32, 16>}, {transform_indices = @transform_1, window_bounds = array<i64: 8, 16>}, {transform_indices = @transform_2, window_bounds = array<i64: 8, 16>}, {transform_indices = @transform_3, window_bounds = array<i64: 32, 16>}]} {
    %c0 = arith.constant 0 : index
    %c0_0 = arith.constant 0 : index
    %0 = vector.load %arg1[%c0, %c0_0] : memref<32x16xf32, #tpu.memory_space<vmem>>, vector<32x16xf32>
    %c7 = arith.constant 7 : index
    %c0_1 = arith.constant 0 : index
    %1 = vector.load %arg2[%c7, %c0_1] : memref<8x16xf32, #tpu.memory_space<vmem>>, vector<1x16xf32>
    %c0_2 = arith.constant 0 : index
    %c0_3 = arith.constant 0 : index
    %2 = vector.load %arg3[%c0_2, %c0_3] : memref<8x16xf32, #tpu.memory_space<vmem>>, vector<1x16xf32>
    %c32_i32 = arith.constant 32 : i32
    %3 = arith.muli %arg0, %c32_i32 : i32
    %4 = tpu.iota {dimensions = array<i32: 0>} : vector<32x1xi32>
    %5 = vector.broadcast %3 : i32 to vector<32x1xi32>
    %6 = arith.addi %5, %4 : vector<32x1xi32>
    %c16_i32 = arith.constant 16 : i32
    %c0_i32 = arith.constant 0 : i32
    %7 = arith.cmpi eq, %c16_i32, %c0_i32 : i32
    %c1_i32 = arith.constant 1 : i32
    %8 = arith.select %7, %c1_i32, %c16_i32 : i32
    %9 = vector.broadcast %8 : i32 to vector<32x1xi32>
    %10 = arith.remsi %6, %9 : vector<32x1xi32>
    %c0_i32_4 = arith.constant 0 : i32
    %11 = vector.broadcast %c0_i32_4 : i32 to vector<32x1xi32>
    %12 = arith.cmpi ne, %10, %11 : vector<32x1xi32>
    %c0_i32_5 = arith.constant 0 : i32
    %13 = vector.broadcast %c0_i32_5 : i32 to vector<32x1xi32>
    %14 = arith.cmpi slt, %10, %13 : vector<32x1xi32>
    %c0_i32_6 = arith.constant 0 : i32
    %15 = arith.cmpi slt, %8, %c0_i32_6 : i32
    %16 = vector.broadcast %15 : i1 to vector<32x1xi1>
    %17 = vector.broadcast %16 : vector<32x1xi1> to vector<32x1xi1>
    %18 = arith.xori %14, %17 : vector<32x1xi1>
    %19 = arith.andi %18, %12 : vector<32x1xi1>
    %20 = vector.broadcast %8 : i32 to vector<32x1xi32>
    %21 = arith.addi %10, %20 : vector<32x1xi32>
    %22 = arith.select %19, %21, %10 : vector<32x1xi1>, vector<32x1xi32>
    %23 = vector.extract_strided_slice %0 {offsets = [0, 0], sizes = [31, 16], strides = [1, 1]} : vector<32x16xf32> to vector<31x16xf32>
    %24 = tpu.concatenate %1, %23 in 0 : vector<1x16xf32>, vector<31x16xf32> -> vector<32x16xf32>
    %25 = vector.extract_strided_slice %0 {offsets = [1, 0], sizes = [31, 16], strides = [1, 1]} : vector<32x16xf32> to vector<31x16xf32>
    %26 = tpu.concatenate %25, %2 in 0 : vector<31x16xf32>, vector<1x16xf32> -> vector<32x16xf32>
    %c0_i32_7 = arith.constant 0 : i32
    %27 = vector.broadcast %c0_i32_7 : i32 to vector<32x1xi32>
    %28 = arith.cmpi eq, %22, %27 : vector<32x1xi32>
    %cst = arith.constant 0.000000e+00 : f32
    %29 = vector.shape_cast %28 : vector<32x1xi1> to vector<32x1xi1>
    %30 = vector.broadcast %29 : vector<32x1xi1> to vector<32x16xi1>
    %31 = vector.broadcast %cst : f32 to vector<32x16xf32>
    %32 = arith.select %30, %31, %24 : vector<32x16xi1>, vector<32x16xf32>
    %c15_i32 = arith.constant 15 : i32
    %33 = vector.broadcast %c15_i32 : i32 to vector<32x1xi32>
    %34 = arith.cmpi eq, %22, %33 : vector<32x1xi32>
    %cst_8 = arith.constant 0.000000e+00 : f32
    %35 = vector.shape_cast %34 : vector<32x1xi1> to vector<32x1xi1>
    %36 = vector.broadcast %35 : vector<32x1xi1> to vector<32x16xi1>
    %37 = vector.broadcast %cst_8 : f32 to vector<32x16xf32>
    %38 = arith.select %36, %37, %26 : vector<32x16xi1>, vector<32x16xf32>
    %cst_9 = arith.constant 2.000000e+00 : f32
    %39 = vector.broadcast %cst_9 : f32 to vector<32x16xf32>
    %40 = arith.mulf %39, %0 : vector<32x16xf32>
    %41 = arith.addf %32, %40 : vector<32x16xf32>
    %42 = arith.addf %41, %38 : vector<32x16xf32>
    %43 = arith.subf %32, %38 : vector<32x16xf32>
    %cst_10 = arith.constant 0.000000e+00 : f32
    %44 = vector.broadcast %cst_10 : f32 to vector<32x1xf32>
    %45 = vector.extract_strided_slice %42 {offsets = [0, 1], sizes = [32, 15], strides = [1, 1]} : vector<32x16xf32> to vector<32x15xf32>
    %46 = tpu.concatenate %45, %44 in 1 : vector<32x15xf32>, vector<32x1xf32> -> vector<32x16xf32>
    %47 = vector.extract_strided_slice %42 {offsets = [0, 0], sizes = [32, 15], strides = [1, 1]} : vector<32x16xf32> to vector<32x15xf32>
    %48 = tpu.concatenate %44, %47 in 1 : vector<32x1xf32>, vector<32x15xf32> -> vector<32x16xf32>
    %49 = arith.subf %46, %48 : vector<32x16xf32>
    %50 = vector.extract_strided_slice %43 {offsets = [0, 0], sizes = [32, 15], strides = [1, 1]} : vector<32x16xf32> to vector<32x15xf32>
    %51 = tpu.concatenate %44, %50 in 1 : vector<32x1xf32>, vector<32x15xf32> -> vector<32x16xf32>
    %cst_11 = arith.constant 2.000000e+00 : f32
    %52 = vector.broadcast %cst_11 : f32 to vector<32x16xf32>
    %53 = arith.mulf %52, %43 : vector<32x16xf32>
    %54 = arith.addf %51, %53 : vector<32x16xf32>
    %55 = vector.extract_strided_slice %43 {offsets = [0, 1], sizes = [32, 15], strides = [1, 1]} : vector<32x16xf32> to vector<32x15xf32>
    %56 = tpu.concatenate %55, %44 in 1 : vector<32x15xf32>, vector<32x1xf32> -> vector<32x16xf32>
    %57 = arith.addf %54, %56 : vector<32x16xf32>
    %58 = math.absf %49 : vector<32x16xf32>
    %59 = math.absf %57 : vector<32x16xf32>
    %60 = arith.addf %58, %59 : vector<32x16xf32>
    %c0_12 = arith.constant 0 : index
    %c0_13 = arith.constant 0 : index
    %61 = vector.load %arg4[%c0_12, %c0_13] : memref<32x16xf32, #tpu.memory_space<vmem>>, vector<32x16xf32>
    tpu.vector_store %arg4[%c0_12, %c0_13], %60 {strides = array<i32>} : memref<32x16xf32, #tpu.memory_space<vmem>>, vector<32x16xf32>,
    return
  }
  func.func @transform_0(%arg0: i32) -> (i32, i32) {
    %c0_i32 = arith.constant 0 : i32
    %c0_i32_0 = arith.constant 0 : i32
    return %arg0, %c0_i32 : i32, i32
  }
  func.func @transform_1(%arg0: i32) -> (i32, i32) {
    %c0_i32 = arith.constant 0 : i32
    %c0_i32_0 = arith.constant 0 : i32
    %c0_i32_1 = arith.constant 0 : i32
    return %c0_i32, %c0_i32_0 : i32, i32
  }
  func.func @transform_2(%arg0: i32) -> (i32, i32) {
    %c0_i32 = arith.constant 0 : i32
    %c0_i32_0 = arith.constant 0 : i32
    %c0_i32_1 = arith.constant 0 : i32
    return %c0_i32, %c0_i32_0 : i32, i32
  }
  func.func @transform_3(%arg0: i32) -> (i32, i32) {
    %c0_i32 = arith.constant 0 : i32
    %c0_i32_0 = arith.constant 0 : i32
    return %arg0, %c0_i32 : i32, i32
  }
}

</mosaic_0001>

<bundles_post_ra>
// kernel: tpu_custom_call.1
= control target key start
LH: loop header
LB: loop body
LE: loop exit
PB: predicated region body
PF: predicated region fallthrough
CT: control target
= control target key end

     0   :  { %v21_v0 = vlaneseq  ;;  %vm83_vm0 = vcmask 1040384   ;;  %vm96_vm1 = vcmask 1046528   ;;  %vm193_vm6 = vcmask 7168   ;;  %s371_s0 = inlined_call_operand.vmem [shape: f32[32,16], index: 0, kind: input, shape index: {}]   ;;  %s372_s1 = inlined_call_operand.vmem [shape: f32[32,16], index: 1, kind: input, shape index: {}]   ;;  %s373_s2 = inlined_call_operand.vmem [shape: f32[32,16], index: 2, kind: input, shape index: {}]   ;;  %s374_s3 = inlined_call_operand.vmem [shape: f32[32,16], index: 3, kind: output, shape index: {}]  }
   0x1   :  { %v14_v1 = vld [vmem:[%s371_s0] sm:$0xff]  ;;  %v15_v2 = vld [vmem:[%s371_s0 + $0x8] sm:$0xff]  ;;  %v16_v8 = vld [vmem:[%s371_s0 + $0x10] sm:$0xff]  ;;  %vm176_vm7 = vcmask 121856   ;;  %vm262_vm8 = vcmask 130048  }
   0x2   :  { %v18_v3 = vld [vmem:[%s372_s1 + $0x7] sm:$0x1]  ;;  %v22_v4 = vshrl.u32 %v21_v0, 7  ;;  %v84_v5 = vrot.slane %v14_v1, 7  ;;  %v97_v6 = vrot.slane %v14_v1, 1  ;;  %v98_v7 = vrot.slane %v15_v2, 1 }
   0x3   :  { %v17_v9 = vld [vmem:[%s371_s0 + $0x18] sm:$0xff]  ;;  %v85_v10 = vrot.slane %v15_v2, 7  ;;  %v87_v11 = vrot.slane %v16_v8, 7  ;;  %v100_v12 = vrot.slane %v16_v8, 1  ;;  %v144_v18 = vmul.f32 2.0, %v14_v1  ;;  %s273_s0 = smov 1  }
   0x4   :  { %v102_v13 = vrot.slane %v17_v9, 1  ;;  %v35_v14 = vand.u32 15, %v22_v4  ;;  %v95_v15 = vsel %vm83_vm0, %v18_v3, %v84_v5  ;;  %v24_v16 = vadd.s32 16, %v22_v4  ;;  %v19_v20 = vld [vmem:[%s373_s2] sm:$0x1]  ;;  %s274_s2 = smov 127  }
   0x5   :  { %v99_v17 = vsel %vm96_vm1, %v97_v6, %v98_v7  ;;  %v23_v19 = vadd.s32 8, %v22_v4  ;;  %v88_v22 = vsel %vm83_vm0, %v85_v10, %v87_v11  ;;  %v101_v26 = vsel %vm96_vm1, %v98_v7, %v100_v12 }
   0x6   :  { %vm112_vm2 = vcmp.eq.s32.totalorder %v35_v14, 0  ;;  %v49_v21 = vand.u32 15, %v24_v16  ;;  %v103_v23 = vsel %vm96_vm1, %v100_v12, %v102_v13  ;;  %v25_v27 = vadd.s32 24, %v22_v4 }
   0x7   :  { %v124_v24 = vsel %vm112_vm2, 0.0, %v95_v15  ;;  %v42_v25 = vand.u32 15, %v23_v19  ;;  %v109_v30 = vrot.slane %v19_v20, 1  ;;  %v89_v33 = vrot.slane %v17_v9, 7 }
   0x8   :  { %v318_v28 = vsub.f32 %v124_v24, %v99_v17  ;;  %vm114_vm3 = vcmp.eq.s32.totalorder %v49_v21, 0  ;;  %v148_v29 = vadd.f32 %v144_v18, %v124_v24  ;;  %v56_v32 = vand.u32 15, %v25_v27 }
   0x9   :  { %v126_v31 = vsel %vm114_vm3, 0.0, %v88_v22  ;;  %vm129_vm4 = vcmp.eq.s32.totalorder %v42_v25, 15  ;;  %v86_v36 = vsel %vm83_vm0, %v84_v5, %v85_v10  ;;  %v111_v37 = vsel %vm96_vm1, %v102_v13, %v109_v30 }
   0xa   :  { %206 = vrot.lane.b32.xlu0 %v318_v28, %s273_s0  ;;  %v158_v34 = vsub.f32 %v126_v31, %v103_v23  ;;  %v152_v35 = vadd.f32 %v148_v29, %v99_v17  ;;  %v141_v38 = vsel %vm129_vm4, 0.0, %v101_v26  ;;  %vm131_vm5 = vcmp.eq.s32.totalorder %v56_v32, 15 }
   0xb   :  { %v145_v39 = vmul.f32 2.0, %v15_v2  ;;  %v90_v40 = vsel %vm83_vm0, %v87_v11, %v89_v33  ;;  %v143_v41 = vsel %vm131_vm5, 0.0, %v111_v37  ;;  %v157_v43 = vsub.f32 %v86_v36, %v141_v38 }
   0xc   :  { %210 = vrot.lane.b32.xlu1 %v158_v34, %s273_s0  ;;  %164 = vrot.lane.b32.xlu2 %v152_v35, %s274_s2  ;;  %v146_v44 = vmul.f32 2.0, %v16_v8  ;;  %v326_v45 = vsub.f32 %v90_v40, %v143_v41  ;;  %v147_v47 = vmul.f32 2.0, %v17_v9  ;;  %v224_v61 = vmul.f32 2.0, %v158_v34 }
   0xd   :  { %v149_v42 = vadd.f32 %v145_v39, %v86_v36  ;;  %v222_v8 = vmul.f32 2.0, %v318_v28  ;;  %v223_v13 = vmul.f32 2.0, %v157_v43 }
   0xe   :  { %v150_v48 = vadd.f32 %v146_v44, %v126_v31  ;;  %v151_v49 = vadd.f32 %v147_v47, %v90_v40  ;;  %v225_v30 = vmul.f32 2.0, %v326_v45 }
   0xf   :  { %v153_v46 = vadd.f32 %v149_v42, %v141_v38 }
  0x10   :  { %v154_v50 = vadd.f32 %v150_v48, %v103_v23  ;;  %v155_v51 = vadd.f32 %v151_v49, %v143_v41 }
  0x12   :  { %208 = vrot.lane.b32.xlu0 %v157_v43, %s273_s0 }
  0x14   :  { %212 = vrot.lane.b32.xlu1 %v326_v45, %s273_s0  ;;  %166 = vrot.lane.b32.xlu2 %v153_v46, %s274_s2 }
  0x1a   :  { %168 = vrot.lane.b32.xlu0 %v154_v50, %s274_s2 }
  0x1c   :  { %170 = vrot.lane.b32.xlu1 %v155_v51, %s274_s2  ;;  %181 = vrot.lane.b32.xlu2 %v152_v35, %s273_s0 }
  0x22   :  { %183 = vrot.lane.b32.xlu0 %v153_v46, %s273_s0 }
  0x24   :  { %185 = vrot.lane.b32.xlu1 %v154_v50, %s273_s0  ;;  %187 = vrot.lane.b32.xlu2 %v155_v51, %s273_s0 }
  0x2a   :  { %230 = vrot.lane.b32.xlu0 %v318_v28, %s274_s2 }
  0x2c   :  { %232 = vrot.lane.b32.xlu1 %v157_v43, %s274_s2  ;;  %234 = vrot.lane.b32.xlu2 %v158_v34, %s274_s2 }
  0x32   :  { %236 = vrot.lane.b32.xlu0 %v326_v45, %s274_s2 }
  0x66   :  { %v165_v52 = vpop.permute.xlu2 %164 }
  0x67   :  { %v177_v10 = vsel %vm176_vm7, %v165_v52, 0.0 }
  0x6e   :  { %v167_v53 = vpop.permute.xlu2 %166 }
  0x6f   :  { %v178_v22 = vsel %vm176_vm7, %v167_v53, 0.0 }
  0x76   :  { %v182_v54 = vpop.permute.xlu2 %181 }
  0x77   :  { %v194_v11 = vsel %vm193_vm6, 0.0, %v182_v54 }
  0x78   :  { %v198_v18 = vsub.f32 %v177_v10, %v194_v11 }
  0x7a   :  { %v250_v29 = vand.u32 2147483647, %v198_v18 }
  0x7c   :  { %v207_v55 = vpop.permute.xlu0 %206 }
  0x7d   :  { %v218_v12 = vsel %vm193_vm6, 0.0, %v207_v55 }
  0x7e   :  { %v211_v56 = vpop.permute.xlu1 %210  ;;  %v188_v58 = vpop.permute.xlu2 %187  ;;  %v226_v19 = vadd.f32 %v222_v8, %v218_v12 }
  0x7f   :  { %v220_v63 = vsel %vm193_vm6, 0.0, %v211_v56  ;;  %v197_v33 = vsel %vm193_vm6, 0.0, %v188_v58 }
  0x80   :  { %v228_v1 = vadd.f32 %v224_v61, %v220_v63 }
  0x84   :  { %v209_v57 = vpop.permute.xlu0 %208 }
  0x85   :  { %v219_v16 = vsel %vm193_vm6, 0.0, %v209_v57 }
  0x86   :  { %v213_v59 = vpop.permute.xlu1 %212  ;;  %v235_v0 = vpop.permute.xlu2 %234  ;;  %v227_v24 = vadd.f32 %v223_v13, %v219_v16 }
  0x87   :  { %v244_v2 = vsel %vm176_vm7, %v235_v0, 0.0  ;;  %v221_v34 = vsel %vm193_vm6, 0.0, %v213_v59 }
  0x88   :  { %v248_v4 = vadd.f32 %v244_v2, %v228_v1  ;;  %v229_v39 = vadd.f32 %v225_v30, %v221_v34 }
  0x8a   :  { %v256_v14 = vand.u32 2147483647, %v248_v4 }
  0x8c   :  { %v169_v60 = vpop.permute.xlu0 %168 }
  0x8d   :  { %v179_v6 = vsel %vm176_vm7, %v169_v60, 0.0 }
  0x8e   :  { %v171_v62 = vpop.permute.xlu1 %170 }
  0x8f   :  { %v180_v35 = vsel %vm176_vm7, %v171_v62, 0.0 }
  0x90   :  { %v201_v40 = vsub.f32 %v180_v35, %v197_v33 }
  0x92   :  { %v253_v45 = vand.u32 2147483647, %v201_v40 }
  0x94   :  { %v184_v3 = vpop.permute.xlu0 %183 }
  0x95   :  { %v195_v17 = vsel %vm193_vm6, 0.0, %v184_v3 }
  0x96   :  { %v186_v5 = vpop.permute.xlu1 %185  ;;  %v199_v25 = vsub.f32 %v178_v22, %v195_v17 }
  0x97   :  { %v196_v7 = vsel %vm193_vm6, 0.0, %v186_v5 }
  0x98   :  { %v200_v9 = vsub.f32 %v179_v6, %v196_v7  ;;  %v251_v36 = vand.u32 2147483647, %v199_v25 }
  0x9a   :  { %v252_v15 = vand.u32 2147483647, %v200_v9 }
  0x9c   :  { %v260_v20 = vadd.f32 %v256_v14, %v252_v15  ;;  %v231_v21 = vpop.permute.xlu0 %230 }
  0x9d   :  { %v242_v23 = vsel %vm176_vm7, %v231_v21, 0.0 }
  0x9e   :  { %265 = vst.msk [vmem:[%s374_s3 + $0x10] sm:$0xff] %vm262_vm8, %v260_v20  ;;  %v246_v26 = vadd.f32 %v242_v23, %v226_v19  ;;  %v233_v27 = vpop.permute.xlu1 %232 }
  0x9f   :  { %v243_v28 = vsel %vm176_vm7, %v233_v27, 0.0 }
  0xa0   :  { %v254_v31 = vand.u32 2147483647, %v246_v26  ;;  %v247_v32 = vadd.f32 %v243_v28, %v227_v24 }
  0xa2   :  { %v258_v37 = vadd.f32 %v254_v31, %v250_v29  ;;  %v255_v38 = vand.u32 2147483647, %v247_v32 }
  0xa4   :  { %263 = vst.msk [vmem:[%s374_s3] sm:$0xff] %vm262_vm8, %v258_v37  ;;  %v259_v41 = vadd.f32 %v255_v38, %v251_v36  ;;  %v237_v42 = vpop.permute.xlu0 %236 }
  0xa5   :  { %v245_v43 = vsel %vm176_vm7, %v237_v42, 0.0 }
  0xa6   :  { %264 = vst.msk [vmem:[%s374_s3 + $0x8] sm:$0xff] %vm262_vm8, %v259_v41  ;;  %v249_v44 = vadd.f32 %v245_v43, %v229_v39 }
  0xa8   :  { %v257_v46 = vand.u32 2147483647, %v249_v44 }
  0xaa   :  { %v261_v47 = vadd.f32 %v257_v46, %v253_v45 }
  0xac   :  { %266 = vst.msk [vmem:[%s374_s3 + $0x18] sm:$0xff] %vm262_vm8, %v261_v47 }

</bundles_post_ra>
